<compile_context>
chip_gen: v6e
topology: v6e:2x2x1
jax: 0.10.0
libtpu: 0.0.40
codegen_flags: <defaults>
</compile_context>

<pallas_src>
import functools

import jax
import jax.numpy as jnp
from jax.experimental import pallas as pl
from jax.experimental.pallas import tpu as pltpu


def _bottleneck_kernel(x_ref, w1_ref, w2_ref, w3_ref,
                       s1_ref, b1_ref, s2_ref, b2_ref, s3_ref, b3_ref,
                       o_ref, *, H, W, C_in, C_mid, C_out):
    # x_ref block: (1, H, W, C_in) ; o_ref block: (1, H, W, C_out)
    x = x_ref[0].astype(jnp.float32)                    # (H, W, C_in)
    xf = x.reshape(H * W, C_in)                         # spatial rows, channel lanes

    # --- conv1 (1x1) + bn1 + relu ---------------------------------------
    # bf16 MXU operands, f32 accumulation, f32 epilogue.
    h1 = jnp.dot(xf.astype(jnp.bfloat16), w1_ref[...],
                 preferred_element_type=jnp.float32)    # (H*W, C_mid)
    h1 = jnp.maximum(h1 * s1_ref[...] + b1_ref[...], 0.0)

    # --- conv2 (3x3, pad=1, stride=1) + bn2 + relu ------------------------
    # Value-level zero padding (no VMEM scratch round-trip), then a single
    # fused im2col matmul with contraction K = 9*C_mid.
    h1_hw = h1.reshape(H, W, C_mid)
    zrow = jnp.zeros((1, W, C_mid), jnp.float32)
    h1_p = jnp.concatenate([zrow, h1_hw, zrow], axis=0)          # (H+2, W,   C_mid)
    zcol = jnp.zeros((H + 2, 1, C_mid), jnp.float32)
    h1_p = jnp.concatenate([zcol, h1_p, zcol], axis=1)           # (H+2, W+2, C_mid)

    taps = [h1_p[kh:kh + H, kw:kw + W, :]                        # each (H, W, C_mid)
            for kh in range(3) for kw in range(3)]               # kh-major order
    patches = jnp.concatenate(taps, axis=-1)                     # (H, W, 9*C_mid)
    patches = patches.reshape(H * W, 9 * C_mid).astype(jnp.bfloat16)

    h2 = jnp.dot(patches, w2_ref[...],                           # (9*C_mid, C_mid)
                 preferred_element_type=jnp.float32)             # (H*W, C_mid)
    h2 = jnp.maximum(h2 * s2_ref[...] + b2_ref[...], 0.0)

    # --- conv3 (1x1) + bn3 -------------------------------------------------
    h3 = jnp.dot(h2.astype(jnp.bfloat16), w3_ref[...],
                 preferred_element_type=jnp.float32)             # (H*W, C_out)
    h3 = h3 * s3_ref[...] + b3_ref[...]

    # --- residual add (identity, f32) + relu -------------------------------
    out = jnp.maximum(h3 + xf, 0.0)                              # C_in == C_out
    o_ref[0] = out.reshape(H, W, C_out).astype(o_ref.dtype)


def _const_spec(shape):
    zeros = (0,) * len(shape)
    return pl.BlockSpec(shape, lambda b, _z=zeros: _z)


def bottleneck_pallas(x_nhwc, w1, w2, w3, s1, b1, s2, b2, s3, b3):
    """x_nhwc: (N,H,W,C_in) f32; w1:(C_in,C_mid); w2:(3,3,C_mid,C_mid) HWIO;
    w3:(C_mid,C_out); s*/b*: folded BN scale/bias rows of shape (1, C)."""
    N, H, W, C_in = x_nhwc.shape
    C_mid = w1.shape[1]
    C_out = w3.shape[1]
    assert C_in == C_out, "no downsample: inplanes must equal planes*expansion"

    # Weights in bf16; 3x3 kernel flattened to (9*C_mid, C_mid), (kh,kw,cin) row-major.
    w1b = w1.astype(jnp.bfloat16)
    w2b = w2.reshape(9 * C_mid, C_mid).astype(jnp.bfloat16)
    w3b = w3.astype(jnp.bfloat16)

    kernel = functools.partial(_bottleneck_kernel, H=H, W=W,
                               C_in=C_in, C_mid=C_mid, C_out=C_out)

    itemsize = x_nhwc.dtype.itemsize
    flops = 2 * N * H * W * (C_in * C_mid + 9 * C_mid * C_mid + C_mid * C_out)
    bytes_accessed = (
        x_nhwc.size * itemsize + N * H * W * C_out * itemsize
        + w1b.size * 2 + w2b.size * 2 + w3b.size * 2
        + 4 * (s1.size + b1.size + s2.size + b2.size + s3.size + b3.size))

    return pl.pallas_call(
        kernel,
        out_shape=jax.ShapeDtypeStruct((N, H, W, C_out), x_nhwc.dtype),
        grid=(N,),
        in_specs=[
            pl.BlockSpec((1, H, W, C_in), lambda b: (b, 0, 0, 0)),
            _const_spec(w1b.shape), _const_spec(w2b.shape), _const_spec(w3b.shape),
            _const_spec(s1.shape), _const_spec(b1.shape),
            _const_spec(s2.shape), _const_spec(b2.shape),
            _const_spec(s3.shape), _const_spec(b3.shape),
        ],
        out_specs=pl.BlockSpec((1, H, W, C_out), lambda b: (b, 0, 0, 0)),
        compiler_params=pltpu.CompilerParams(
            dimension_semantics=("parallel",),
            vmem_limit_bytes=32 * 1024 * 1024),
        cost_estimate=pl.CostEstimate(flops=flops, transcendentals=0,
                                      bytes_accessed=bytes_accessed),
    )(x_nhwc, w1b, w2b, w3b, s1, b1, s2, b2, s3, b3)


def bottleneck_reference(x_nhwc, w1, w2, w3, s1, b1, s2, b2, s3, b3):
    """Pure-JAX f32 reference (XLA convs) for correctness checking."""
    h = jnp.einsum('nhwc,cd->nhwd', x_nhwc, w1)
    h = jnp.maximum(h * s1 + b1, 0.0)
    h = jax.lax.conv_general_dilated(
        h, w2, window_strides=(1, 1), padding='SAME',
        dimension_numbers=('NHWC', 'HWIO', 'NHWC'))
    h = jnp.maximum(h * s2 + b2, 0.0)
    h = jnp.einsum('nhwc,cd->nhwd', h, w3)
    h = h * s3 + b3
    return jnp.maximum(h + x_nhwc, 0.0)


def fold_bn(gamma, beta, mean, var, eps=1e-5):
    scale = gamma / jnp.sqrt(var + eps)
    bias = beta - mean * scale
    return scale[None, :], bias[None, :]          # (1, C) rows for broadcasting


if __name__ == "__main__":
    key = jax.random.PRNGKey(0)
    ks = jax.random.split(key, 8)

    # Bottleneck(inplanes=128, planes=32): identity residual => C_in == C_out = 128
    # (channel dims chosen as multiples of 128 lanes so output stores are unmasked).
    N, H, W = 2, 8, 8
    planes = 32
    C_mid = planes
    C_in = C_out = planes * 4

    # Input in PyTorch NCHW convention, transposed to NHWC for the kernel.
    x_nchw = jax.random.normal(ks[0], (N, C_in, H, W), jnp.float32)
    x_nhwc = jnp.transpose(x_nchw, (0, 2, 3, 1))

    def bf16_round(a):  # pre-round weights so kernel & reference see identical weights
        return a.astype(jnp.bfloat16).astype(jnp.float32)

    # Conv weights (bias=False).  1x1 convs stored as (Cin, Cout); 3x3 as HWIO.
    w1 = bf16_round(jax.random.normal(ks[1], (C_in, C_mid), jnp.float32) * 0.1)
    w2 = bf16_round(jax.random.normal(ks[2], (3, 3, C_mid, C_mid), jnp.float32) * 0.1)
    w3 = bf16_round(jax.random.normal(ks[3], (C_mid, C_out), jnp.float32) * 0.1)

    # BatchNorm parameters (eval mode), folded to per-channel scale/bias.
    def bn_params(k, c):
        kg, kb, km, kv = jax.random.split(k, 4)
        gamma = 1.0 + 0.1 * jax.random.normal(kg, (c,), jnp.float32)
        beta = 0.1 * jax.random.normal(kb, (c,), jnp.float32)
        mean = 0.1 * jax.random.normal(km, (c,), jnp.float32)
        var = jnp.abs(jax.random.normal(kv, (c,), jnp.float32)) + 0.5
        return fold_bn(gamma, beta, mean, var)

    s1, b1 = bn_params(ks[4], C_mid)
    s2, b2 = bn_params(ks[5], C_mid)
    s3, b3 = bn_params(ks[6], C_out)

    out_nhwc = bottleneck_pallas(x_nhwc, w1, w2, w3, s1, b1, s2, b2, s3, b3)
    out_nhwc = jax.block_until_ready(out_nhwc)

    ref_nhwc = bottleneck_reference(x_nhwc, w1, w2, w3, s1, b1, s2, b2, s3, b3)
    ref_nhwc = jax.block_until_ready(ref_nhwc)

    # Back to NCHW to match the PyTorch output convention.
    out_nchw = jnp.transpose(out_nhwc, (0, 3, 1, 2))
    assert out_nchw.shape == (N, C_out, H, W)
    # bf16 MXU operands vs full-f32 reference -> relaxed tolerance.
    max_err = float(jnp.max(jnp.abs(out_nhwc - ref_nhwc)))
    assert jnp.allclose(out_nhwc, ref_nhwc, atol=5e-2, rtol=5e-2), max_err

    print("KERNEL_OK")
</pallas_src>

<mosaic_0001>
module attributes {stable_mosaic.version = 11 : i64} {
  func.func @_bottleneck_kernel(%arg0: i32, %arg1: memref<1x8x8x128xf32, #tpu.memory_space<vmem>>, %arg2: memref<128x32xbf16, #tpu.memory_space<vmem>>, %arg3: memref<288x32xbf16, #tpu.memory_space<vmem>>, %arg4: memref<32x128xbf16, #tpu.memory_space<vmem>>, %arg5: memref<1x32xf32, #tpu.memory_space<vmem>>, %arg6: memref<1x32xf32, #tpu.memory_space<vmem>>, %arg7: memref<1x32xf32, #tpu.memory_space<vmem>>, %arg8: memref<1x32xf32, #tpu.memory_space<vmem>>, %arg9: memref<1x128xf32, #tpu.memory_space<vmem>>, %arg10: memref<1x128xf32, #tpu.memory_space<vmem>>, %arg11: memref<1x8x8x128xf32, #tpu.memory_space<vmem>>) attributes {dimension_semantics = [#tpu.dimension_semantics<parallel>], iteration_bounds = array<i64: 2>, scalar_prefetch = 0 : i64, scratch_operands = 0 : i64, tpu.core_type = #tpu.core_type<tc>, window_params = [{transform_indices = @transform_0, window_bounds = array<i64: 1, 8, 8, 128>}, {pipeline_mode = #tpu.pipeline_mode<synchronous>, transform_indices = @transform_1, window_bounds = array<i64: 128, 32>}, {pipeline_mode = #tpu.pipeline_mode<synchronous>, transform_indices = @transform_2, window_bounds = array<i64: 288, 32>}, {pipeline_mode = #tpu.pipeline_mode<synchronous>, transform_indices = @transform_3, window_bounds = array<i64: 32, 128>}, {pipeline_mode = #tpu.pipeline_mode<synchronous>, transform_indices = @transform_4, window_bounds = array<i64: 1, 32>}, {pipeline_mode = #tpu.pipeline_mode<synchronous>, transform_indices = @transform_5, window_bounds = array<i64: 1, 32>}, {pipeline_mode = #tpu.pipeline_mode<synchronous>, transform_indices = @transform_6, window_bounds = array<i64: 1, 32>}, {pipeline_mode = #tpu.pipeline_mode<synchronous>, transform_indices = @transform_7, window_bounds = array<i64: 1, 32>}, {pipeline_mode = #tpu.pipeline_mode<synchronous>, transform_indices = @transform_8, window_bounds = array<i64: 1, 128>}, {pipeline_mode = #tpu.pipeline_mode<synchronous>, transform_indices = @transform_9, window_bounds = array<i64: 1, 128>}, {transform_indices = @transform_10, window_bounds = array<i64: 1, 8, 8, 128>}]} {
    %c0 = arith.constant 0 : index
    %c0_0 = arith.constant 0 : index
    %c0_1 = arith.constant 0 : index
    %c0_2 = arith.constant 0 : index
    %0 = vector.load %arg1[%c0, %c0_0, %c0_1, %c0_2] : memref<1x8x8x128xf32, #tpu.memory_space<vmem>>, vector<1x8x8x128xf32>
    %1 = vector.shape_cast %0 : vector<1x8x8x128xf32> to vector<8x8x128xf32>
    %2 = vector.shape_cast %1 : vector<8x8x128xf32> to vector<64x128xf32>
    %3 = arith.truncf %2 : vector<64x128xf32> to vector<64x128xbf16>
    %c0_3 = arith.constant 0 : index
    %c0_4 = arith.constant 0 : index
    %4 = vector.load %arg2[%c0_3, %c0_4] : memref<128x32xbf16, #tpu.memory_space<vmem>>, vector<128x32xbf16>
    %cst = arith.constant dense<0.000000e+00> : vector<64x32xf32>
    %5 = tpu.matmul %3, %4, %cst {dimension_numbers = #tpu.dot_dimension_numbers<[1], [0], [0], [1], [0, 0, 1, 1], [], []>} : vector<64x128xbf16>, vector<128x32xbf16>, vector<64x32xf32> -> vector<64x32xf32>
    %c0_5 = arith.constant 0 : index
    %c0_6 = arith.constant 0 : index
    %6 = vector.load %arg5[%c0_5, %c0_6] : memref<1x32xf32, #tpu.memory_space<vmem>>, vector<1x32xf32>
    %7 = vector.broadcast %6 : vector<1x32xf32> to vector<64x32xf32>
    %8 = arith.mulf %5, %7 : vector<64x32xf32>
    %c0_7 = arith.constant 0 : index
    %c0_8 = arith.constant 0 : index
    %9 = vector.load %arg6[%c0_7, %c0_8] : memref<1x32xf32, #tpu.memory_space<vmem>>, vector<1x32xf32>
    %10 = vector.broadcast %9 : vector<1x32xf32> to vector<64x32xf32>
    %11 = arith.addf %8, %10 : vector<64x32xf32>
    %cst_9 = arith.constant 0.000000e+00 : f32
    %12 = vector.broadcast %cst_9 : f32 to vector<64x32xf32>
    %13 = arith.maximumf %11, %12 : vector<64x32xf32>
    %14 = vector.shape_cast %13 : vector<64x32xf32> to vector<8x8x32xf32>
    %cst_10 = arith.constant 0.000000e+00 : f32
    %15 = vector.broadcast %cst_10 : f32 to vector<1x8x32xf32>
    %16 = tpu.concatenate %15, %14, %15 in 0 : vector<1x8x32xf32>, vector<8x8x32xf32>, vector<1x8x32xf32> -> vector<10x8x32xf32>
    %cst_11 = arith.constant 0.000000e+00 : f32
    %17 = vector.broadcast %cst_11 : f32 to vector<10x1x32xf32>
    %18 = tpu.concatenate %17, %16, %17 in 1 : vector<10x1x32xf32>, vector<10x8x32xf32>, vector<10x1x32xf32> -> vector<10x10x32xf32>
    %19 = vector.extract_strided_slice %18 {offsets = [0, 0, 0], sizes = [8, 8, 32], strides = [1, 1, 1]} : vector<10x10x32xf32> to vector<8x8x32xf32>
    %20 = vector.extract_strided_slice %18 {offsets = [0, 1, 0], sizes = [8, 8, 32], strides = [1, 1, 1]} : vector<10x10x32xf32> to vector<8x8x32xf32>
    %21 = vector.extract_strided_slice %18 {offsets = [0, 2, 0], sizes = [8, 8, 32], strides = [1, 1, 1]} : vector<10x10x32xf32> to vector<8x8x32xf32>
    %22 = vector.extract_strided_slice %18 {offsets = [1, 0, 0], sizes = [8, 8, 32], strides = [1, 1, 1]} : vector<10x10x32xf32> to vector<8x8x32xf32>
    %23 = vector.extract_strided_slice %18 {offsets = [1, 1, 0], sizes = [8, 8, 32], strides = [1, 1, 1]} : vector<10x10x32xf32> to vector<8x8x32xf32>
    %24 = vector.extract_strided_slice %18 {offsets = [1, 2, 0], sizes = [8, 8, 32], strides = [1, 1, 1]} : vector<10x10x32xf32> to vector<8x8x32xf32>
    %25 = vector.extract_strided_slice %18 {offsets = [2, 0, 0], sizes = [8, 8, 32], strides = [1, 1, 1]} : vector<10x10x32xf32> to vector<8x8x32xf32>
    %26 = vector.extract_strided_slice %18 {offsets = [2, 1, 0], sizes = [8, 8, 32], strides = [1, 1, 1]} : vector<10x10x32xf32> to vector<8x8x32xf32>
    %27 = vector.extract_strided_slice %18 {offsets = [2, 2, 0], sizes = [8, 8, 32], strides = [1, 1, 1]} : vector<10x10x32xf32> to vector<8x8x32xf32>
    %28 = tpu.concatenate %19, %20, %21, %22, %23, %24, %25, %26, %27 in 2 : vector<8x8x32xf32>, vector<8x8x32xf32>, vector<8x8x32xf32>, vector<8x8x32xf32>, vector<8x8x32xf32>, vector<8x8x32xf32>, vector<8x8x32xf32>, vector<8x8x32xf32>, vector<8x8x32xf32> -> vector<8x8x288xf32>
    %29 = vector.shape_cast %28 : vector<8x8x288xf32> to vector<64x288xf32>
    %30 = arith.truncf %29 : vector<64x288xf32> to vector<64x288xbf16>
    %c0_12 = arith.constant 0 : index
    %c0_13 = arith.constant 0 : index
    %31 = vector.load %arg3[%c0_12, %c0_13] : memref<288x32xbf16, #tpu.memory_space<vmem>>, vector<288x32xbf16>
    %cst_14 = arith.constant dense<0.000000e+00> : vector<64x32xf32>
    %32 = tpu.matmul %30, %31, %cst_14 {dimension_numbers = #tpu.dot_dimension_numbers<[1], [0], [0], [1], [0, 0, 1, 1], [], []>} : vector<64x288xbf16>, vector<288x32xbf16>, vector<64x32xf32> -> vector<64x32xf32>
    %c0_15 = arith.constant 0 : index
    %c0_16 = arith.constant 0 : index
    %33 = vector.load %arg7[%c0_15, %c0_16] : memref<1x32xf32, #tpu.memory_space<vmem>>, vector<1x32xf32>
    %34 = vector.broadcast %33 : vector<1x32xf32> to vector<64x32xf32>
    %35 = arith.mulf %32, %34 : vector<64x32xf32>
    %c0_17 = arith.constant 0 : index
    %c0_18 = arith.constant 0 : index
    %36 = vector.load %arg8[%c0_17, %c0_18] : memref<1x32xf32, #tpu.memory_space<vmem>>, vector<1x32xf32>
    %37 = vector.broadcast %36 : vector<1x32xf32> to vector<64x32xf32>
    %38 = arith.addf %35, %37 : vector<64x32xf32>
    %cst_19 = arith.constant 0.000000e+00 : f32
    %39 = vector.broadcast %cst_19 : f32 to vector<64x32xf32>
    %40 = arith.maximumf %38, %39 : vector<64x32xf32>
    %41 = arith.truncf %40 : vector<64x32xf32> to vector<64x32xbf16>
    %c0_20 = arith.constant 0 : index
    %c0_21 = arith.constant 0 : index
    %42 = vector.load %arg4[%c0_20, %c0_21] : memref<32x128xbf16, #tpu.memory_space<vmem>>, vector<32x128xbf16>
    %cst_22 = arith.constant dense<0.000000e+00> : vector<64x128xf32>
    %43 = tpu.matmul %41, %42, %cst_22 {dimension_numbers = #tpu.dot_dimension_numbers<[1], [0], [0], [1], [0, 0, 1, 1], [], []>} : vector<64x32xbf16>, vector<32x128xbf16>, vector<64x128xf32> -> vector<64x128xf32>
    %c0_23 = arith.constant 0 : index
    %c0_24 = arith.constant 0 : index
    %44 = vector.load %arg9[%c0_23, %c0_24] : memref<1x128xf32, #tpu.memory_space<vmem>>, vector<1x128xf32>
    %45 = vector.broadcast %44 : vector<1x128xf32> to vector<64x128xf32>
    %46 = arith.mulf %43, %45 : vector<64x128xf32>
    %c0_25 = arith.constant 0 : index
    %c0_26 = arith.constant 0 : index
    %47 = vector.load %arg10[%c0_25, %c0_26] : memref<1x128xf32, #tpu.memory_space<vmem>>, vector<1x128xf32>
    %48 = vector.broadcast %47 : vector<1x128xf32> to vector<64x128xf32>
    %49 = arith.addf %46, %48 : vector<64x128xf32>
    %50 = arith.addf %49, %2 : vector<64x128xf32>
    %cst_27 = arith.constant 0.000000e+00 : f32
    %51 = vector.broadcast %cst_27 : f32 to vector<64x128xf32>
    %52 = arith.maximumf %50, %51 : vector<64x128xf32>
    %53 = vector.shape_cast %52 : vector<64x128xf32> to vector<8x8x128xf32>
    %c0_28 = arith.constant 0 : index
    %c0_29 = arith.constant 0 : index
    %c0_30 = arith.constant 0 : index
    %c0_31 = arith.constant 0 : index
    %54 = vector.load %arg11[%c0_28, %c0_29, %c0_30, %c0_31] : memref<1x8x8x128xf32, #tpu.memory_space<vmem>>, vector<1x8x8x128xf32>
    %55 = vector.shape_cast %54 : vector<1x8x8x128xf32> to vector<8x8x128xf32>
    %56 = vector.shape_cast %53 : vector<8x8x128xf32> to vector<1x8x8x128xf32>
    tpu.vector_store %arg11[%c0_28, %c0_29, %c0_30, %c0_31], %56 {strides = array<i32>} : memref<1x8x8x128xf32, #tpu.memory_space<vmem>>, vector<1x8x8x128xf32>,
    return
  }
  func.func @transform_0(%arg0: i32) -> (i32, i32, i32, i32) {
    %c0_i32 = arith.constant 0 : i32
    %c0_i32_0 = arith.constant 0 : i32
    %c0_i32_1 = arith.constant 0 : i32
    %c0_i32_2 = arith.constant 0 : i32
    return %arg0, %c0_i32, %c0_i32_0, %c0_i32_1 : i32, i32, i32, i32
  }
  func.func @transform_1(%arg0: i32) -> (i32, i32) {
    %c0_i32 = arith.constant 0 : i32
    %c0_i32_0 = arith.constant 0 : i32
    %c0_i32_1 = arith.constant 0 : i32
    return %c0_i32, %c0_i32_0 : i32, i32
  }
  func.func @transform_2(%arg0: i32) -> (i32, i32) {
    %c0_i32 = arith.constant 0 : i32
    %c0_i32_0 = arith.constant 0 : i32
    %c0_i32_1 = arith.constant 0 : i32
    return %c0_i32, %c0_i32_0 : i32, i32
  }
  func.func @transform_3(%arg0: i32) -> (i32, i32) {
    %c0_i32 = arith.constant 0 : i32
    %c0_i32_0 = arith.constant 0 : i32
    %c0_i32_1 = arith.constant 0 : i32
    return %c0_i32, %c0_i32_0 : i32, i32
  }
  func.func @transform_4(%arg0: i32) -> (i32, i32) {
    %c0_i32 = arith.constant 0 : i32
    %c0_i32_0 = arith.constant 0 : i32
    %c0_i32_1 = arith.constant 0 : i32
    return %c0_i32, %c0_i32_0 : i32, i32
  }
  func.func @transform_5(%arg0: i32) -> (i32, i32) {
    %c0_i32 = arith.constant 0 : i32
    %c0_i32_0 = arith.constant 0 : i32
    %c0_i32_1 = arith.constant 0 : i32
    return %c0_i32, %c0_i32_0 : i32, i32
  }
  func.func @transform_6(%arg0: i32) -> (i32, i32) {
    %c0_i32 = arith.constant 0 : i32
    %c0_i32_0 = arith.constant 0 : i32
    %c0_i32_1 = arith.constant 0 : i32
    return %c0_i32, %c0_i32_0 : i32, i32
  }
  func.func @transform_7(%arg0: i32) -> (i32, i32) {
    %c0_i32 = arith.constant 0 : i32
    %c0_i32_0 = arith.constant 0 : i32
    %c0_i32_1 = arith.constant 0 : i32
    return %c0_i32, %c0_i32_0 : i32, i32
  }
  func.func @transform_8(%arg0: i32) -> (i32, i32) {
    %c0_i32 = arith.constant 0 : i32
    %c0_i32_0 = arith.constant 0 : i32
    %c0_i32_1 = arith.constant 0 : i32
    return %c0_i32, %c0_i32_0 : i32, i32
  }
  func.func @transform_9(%arg0: i32) -> (i32, i32) {
    %c0_i32 = arith.constant 0 : i32
    %c0_i32_0 = arith.constant 0 : i32
    %c0_i32_1 = arith.constant 0 : i32
    return %c0_i32, %c0_i32_0 : i32, i32
  }
  func.func @transform_10(%arg0: i32) -> (i32, i32, i32, i32) {
    %c0_i32 = arith.constant 0 : i32
    %c0_i32_0 = arith.constant 0 : i32
    %c0_i32_1 = arith.constant 0 : i32
    %c0_i32_2 = arith.constant 0 : i32
    return %arg0, %c0_i32, %c0_i32_0, %c0_i32_1 : i32, i32, i32, i32
  }
}

</mosaic_0001>

<bundles_post_ra>
// kernel: tpu_custom_call.1
= control target key start
LH: loop header
LB: loop body
LE: loop exit
PB: predicated region body
PF: predicated region fallthrough
CT: control target
= control target key end

     0   :  { %15 = vsyncpa [#allocation3], 0  ;;  %s2493_s0 = inlined_call_operand.vmem [shape: f32[2,8,8,128], index: 0, kind: input, shape index: {}]   ;;  %s2494_s1 = inlined_call_operand.vmem [shape: bf16[128,32], index: 1, kind: input, shape index: {}]   ;;  %s2495_s2 = inlined_call_operand.vmem [shape: bf16[288,32], index: 2, kind: input, shape index: {}]   ;;  %s2496_s3 = inlined_call_operand.vmem [shape: bf16[32,128], index: 3, kind: input, shape index: {}]   ;;  %s2497_s4 = inlined_call_operand.vmem [shape: f32[1,32], index: 4, kind: input, shape index: {}]   ;;  %s2498_s5 = inlined_call_operand.vmem [shape: f32[1,32], index: 5, kind: input, shape index: {}]   ;;  %s2499_s6 = inlined_call_operand.vmem [shape: f32[1,32], index: 6, kind: input, shape index: {}]   ;;  %s2500_s7 = inlined_call_operand.vmem [shape: f32[1,32], index: 7, kind: input, shape index: {}]   ;;  %s2501_s8 = inlined_call_operand.vmem [shape: f32[1,128], index: 8, kind: input, shape index: {}]   ;;  %s2502_s9 = inlined_call_operand.vmem [shape: f32[1,128], index: 9, kind: input, shape index: {}]   ;;  %s2503_s10 = inlined_call_operand.hbm [shape: f32[2,8,8,128], index: 10, kind: output, shape index: {}]  }
   0x1   :  { %17 = vsyncpa [#allocation3 + $0x1], 0  ;;  %s1923_s13 = smov 0   ;;  %s1925_s14 = smov 0  }
   0x2   :  { %s1927_s15 = smov 0   ;;  %s1929_s16 = smov 0  }
   0x3 LB: > { %s1944_s17 = sadd.s32 4294967295, %s1859_s16   ;;  %s1432_s18 = sadd.s32 4294967294, %s1859_s16   ;;  %s1859_s16 = sphi %s1929_s16, %s2509_s16   ;;  %s1855_s15 = sphi %s1927_s15, %s2508_s15   ;;  %s1851_s14 = sphi %s1925_s14, %s2507_s14   ;;  %s1847_s13 = sphi %s1923_s13, %s2506_s13  }
   0x4   : > { %s1948_s19 = sadd.s32 1, %s1859_s16   ;;  %s245_s20 = sadd.s32 1, %s1855_s15 }
   0x5   : > { %s242_s21 = ssub.s32 %s1859_s16, %s1948_s19  ;;  %p255_p0 = scmp.ne.s32.totalorder %s1855_s15, %s1851_s14 }
   0x6   : > { %p243_p1 = scmp.eq.s32.totalorder %s242_s21, 0  ;;  %p256_p2 = scmp.eq.s32.totalorder %s1944_s17, 1 }
   0x7   : > { %p261_p3 = scmp.ne.s32.totalorder %s1851_s14, %s1847_s13  ;;  %p262_p4 = scmp.eq.s32.totalorder %s1432_s18, 1 }
   0x8   : > { %s1959_s22 = scalar_select %p243_p1, %s1855_s15, %s245_s20  }
   0x9   : > { %p1961_p5 = por %p256_p2, %p255_p0  ;;  %p1965_p6 = por %p262_p4, %p261_p3 }
   0xa   : > { %p1435_p7 = scmp.ge.s32.totalorder %s1859_s16, 1  ;;  %p315_p8 = scmp.lt.s32.totalorder %s1859_s16, 3 }
   0xc   : > { %p316_p9 = pnand %p1435_p7, %p315_p8 }
   0xd   : > { %p353_p10 = scmp.lt.s32.totalorder (!%p316_p9), %s1944_s17, 1  ;;  %s1862_s25 = smov (!%p316_p9), 96  }
   0xe   : > { %319 = sbr.rel (%p316_p9) target bundleno = 868 (0x364), region = 60  ;;  %s1863_s28 = smov (!%p316_p9), 32  }
   0xf   : > { %s1864_s26 = smov (!%p316_p9), 64  }
  0x13   : > { %v1769_v0 = vld [vmem:[%s2494_s1 + $0x38] sm:$0xff]   ;;  %v1770_v1 = vld [vmem:[%s2494_s1 + $0x30] sm:$0xff]   ;;  %s354_s29 = scalar_select %p353_p10, %s1944_s17, 1  ;;  %v1771_v2 = vld [vmem:[%s2494_s1 + $0x28] sm:$0xff]   ;;  %v1861_v33 = vmov 0.0   ;;  %vm565_vm0 = vcmask 1040384  }
  0x14   : > { %1552 = vmatprep.subr.bf16.mxu0 %v1769_v0  ;;  %v1772_v3 = vld [vmem:[%s2494_s1 + $0x20] sm:$0xff]   ;;  %v1773_v7 = vld [vmem:[%s2494_s1 + $0x18] sm:$0xff]   ;;  %v1774_v8 = vld [vmem:[%s2494_s1 + $0x10] sm:$0xff]   ;;  %v547_v34 = vrot.slane %v1861_v33, 7  ;;  %vm600_vm1 = vcmask 1046528   ;;  %vm649_vm2 = vcmask 1045504  }
  0x15   : > { %1553 = vmatpush3.bf16.msra.mxu0 %v1769_v0  ;;  %s1486_s12 = sshll.u32 %s354_s29, 6  ;;  %v1775_v9 = vld [vmem:[%s2494_s1 + $0x8] sm:$0xff]   ;;  %v1776_v10 = vld [vmem:[%s2494_s1] sm:$0xff]   ;;  %v1779_v22 = vld [vmem:[%s2495_s2 + $0x78] sm:$0xff]   ;;  %vm818_vm3 = vcmask 261120   ;;  %vm827_vm4 = vcmask 523264  }
  0x16   : > { %1554 = vmatprep.subr.bf16.mxu0 %v1770_v1  ;;  %s1985_s21 = scalar_lea.vmem %s2493_s0, %s1486_s12  ;;  %v2031_v20 = vld [vmem:[%s2495_s2 + $0x88] sm:$0xff]   ;;  %v2038_v21 = vld [vmem:[%s2495_s2 + $0x80] sm:$0xff]   ;;  %v1780_v23 = vld [vmem:[%s2495_s2 + $0x38] sm:$0xff]   ;;  %1500 = vmatprep.subr.bf16.mxu1 %v1779_v22  ;;  %v2082_v42 = vsel %vm565_vm0, 0.0, %v547_v34  ;;  %v2085_v43 = vsel %vm565_vm0, %v547_v34, 0.0  ;;  %vm836_vm5 = vcmask 785408  }
  0x17   : > { %v359_v4 = vld [vmem:[%s1985_s21] sm:$0xff]  ;;  %v360_v5 = vld [vmem:[%s1985_s21 + $0x8] sm:$0xff]  ;;  %v2005_v11 = vld [vmem:[%s1985_s21 + $0x10] sm:$0xff]  ;;  %1501 = vmatpush3.bf16.msra.mxu1 %v1780_v23  ;;  %v601_v51 = vrot.slane %v2082_v42, 1  ;;  %v602_v52 = vrot.slane %v2085_v43, 1 }
  0x18   : > { %v367_v6 = vpack.c.bf16 %v360_v5, %v359_v4  ;;  %v2008_v12 = vld [vmem:[%s1985_s21 + $0x18] sm:$0xff]  ;;  %v2011_v13 = vld [vmem:[%s1985_s21 + $0x20] sm:$0xff]  ;;  %v2014_v14 = vld [vmem:[%s1985_s21 + $0x28] sm:$0xff] }
  0x19   : > { %1555 = vmatpush3.bf16.msra.mxu0 %v1770_v1  ;;  %v368_v15 = vpack.c.bf16 %v2008_v12, %v2005_v11  ;;  %v369_v16 = vpack.c.bf16 %v2014_v14, %v2011_v13  ;;  %v2021_v17 = vld [vmem:[%s1985_s21 + $0x30] sm:$0xff]  ;;  %v2024_v18 = vld [vmem:[%s1985_s21 + $0x38] sm:$0xff]  ;;  %v1783_v26 = vld [vmem:[%s2495_s2 + $0x68] sm:$0xff]   ;;  %v2105_v1 = vsel %vm600_vm1, %v601_v51, %v602_v52 }
  0x1a   : > { %1556 = vmatprep.subr.bf16.mxu0 %v1771_v2  ;;  %1568 = vmatprep.mubr.bf16.mxu0 %v367_v6  ;;  %v370_v19 = vpack.c.bf16 %v2024_v18, %v2021_v17  ;;  %v1781_v24 = vld [vmem:[%s2495_s2 + $0x70] sm:$0xff]   ;;  %v1784_v27 = vld [vmem:[%s2495_s2 + $0x28] sm:$0xff]   ;;  %v1785_v28 = vld [vmem:[%s2495_s2 + $0x60] sm:$0xff]  }
  0x1b   : > { %v1782_v25 = vld [vmem:[%s2495_s2 + $0x30] sm:$0xff]   ;;  %1502 = vmatprep.subr.bf16.mxu1 %v1781_v24  ;;  %v2066_v29 = vld [vmem:[%s2497_s4] ss:$0 sm:$0xff]  ;;  %v1787_v49 = vld [vmem:[%s2495_s2 + $0x58] sm:$0xff]  }
  0x1c   : > { %1503 = vmatpush3.bf16.msra.mxu1 %v1782_v25  ;;  %v2071_v31 = vld [vmem:[%s2498_s5] ss:$0 sm:$0xff]  ;;  %v1788_v25 = vld [vmem:[%s2495_s2 + $0x18] sm:$0xff]  }
  0x1d   : > { %1557 = vmatpush3.bf16.msra.mxu0 %v1771_v2  ;;  %1504 = vmatprep.subr.bf16.mxu1 %v1783_v26  ;;  %v1786_v39 = vld [vmem:[%s2495_s2 + $0x20] sm:$0xff]   ;;  %v651_v2 = vrot.slane %v2085_v43, 2  ;;  %v1789_v26 = vld [vmem:[%s2495_s2 + $0x50] sm:$0xff]  }
  0x1e   : > { %1558 = vmatprep.subr.bf16.mxu0 %v1772_v3 }
  0x20   : > { %1505 = vmatpush3.bf16.msra.mxu1 %v1784_v27 }
  0x21   : > { %1559 = vmatpush3.bf16.msra.mxu0 %v1772_v3  ;;  %1506 = vmatprep.subr.bf16.mxu1 %v1785_v28 }
  0x22   : > { %1560 = vmatprep.subr.bf16.mxu0 %v1773_v7 }
  0x24   : > { %1507 = vmatpush3.bf16.msra.mxu1 %v1786_v39 }
  0x25   : > { %1561 = vmatpush3.bf16.msra.mxu0 %v1773_v7  ;;  %1508 = vmatprep.subr.bf16.mxu1 %v1787_v49 }
  0x26   : > { %1562 = vmatprep.subr.bf16.mxu0 %v1774_v8 }
  0x28   : > { %1509 = vmatpush3.bf16.msra.mxu1 %v1788_v25  ;;  %v1794_v25 = vld [vmem:[%s2495_s2] sm:$0xff]  }
  0x29   : > { %1563 = vmatpush3.bf16.msra.mxu0 %v1774_v8  ;;  %1510 = vmatprep.subr.bf16.mxu1 %v1789_v26 }
  0x2a   : > { %1564 = vmatprep.subr.bf16.mxu0 %v1775_v9 }
  0x2d   : > { %1565 = vmatpush3.bf16.msra.mxu0 %v1775_v9 }
  0x2e   : > { %1566 = vmatprep.subr.bf16.mxu0 %v1776_v10 }
  0x31   : > { %1567 = vmatpush3.bf16.msra.mxu0 %v1776_v10 }
  0x32   : > { %1576 = vmatprep.subr.bf16.mxu0 %v2031_v20 }
  0x34   : > { %1569 = vmatmul.mubr.bf16.vlgmr.msra.gmra.mxu0 %v368_v15  ;;  %v650_v15 = vrot.slane %v2082_v42, 2 }
  0x35   : > { %1572 = vmatprep.mubr.bf16.mxu0 %v369_v16  ;;  %1577 = vmatpush3.bf16.msra.mxu0 %v2031_v20 }
  0x36   : > { %1578 = vmatprep.subr.bf16.mxu0 %v2038_v21  ;;  %v2168_v49 = vsel %vm649_vm2, %v650_v15, %v651_v2 }
  0x39   : > { %1579 = vmatpush3.bf16.msra.mxu0 %v2038_v21 }
  0x3c   : > { %1573 = vmatmul.mubr.bf16.gmra.mxu0 %v370_v19 }
  0xf4   : > { %v1570_v30 = vpop.f32.mrf.mxu0 }
  0xf5   : > { %v509_v32 = vmul.f32 %v1570_v30, %v2066_v29 }
  0xf6   : > { %v469_v35 = vpop.f32.mrf.mxu0 }
  0xf7   : > { %v524_v36 = vadd.f32 %v2071_v31, %v509_v32  ;;  %v507_v37 = vmul.f32 %v2066_v29, %v469_v35 }
  0xf8   : > { %v1571_v38 = vpop.f32.mrf.mxu0 }
  0xf9   : > { %v522_v40 = vadd.f32 %v2071_v31, %v507_v37  ;;  %v510_v41 = vmul.f32 %v1571_v38, %v2066_v29  ;;  %v532_v44 = vmax.f32 %v524_v36, 0.0  ;;  %v1790_v36 = vld [vmem:[%s2495_s2 + $0x10] sm:$0xff]  }
  0xfa   : > { %v472_v45 = vpop.f32.mrf.mxu0  ;;  %1511 = vmatpush3.bf16.msra.mxu1 %v1790_v36 }
  0xfb   : > { %v530_v46 = vmax.f32 %v522_v40, 0.0  ;;  %v525_v47 = vadd.f32 %v2071_v31, %v510_v41  ;;  %v508_v48 = vmul.f32 %v2066_v29, %v472_v45  ;;  %v550_v55 = vrot.slane %v532_v44, 7  ;;  %v1791_v41 = vld [vmem:[%s2495_s2 + $0x48] sm:$0xff]  }
  0xfc   : > { %v1574_v50 = vpop.f32.mrf.mxu0  ;;  %1512 = vmatprep.subr.bf16.mxu1 %v1791_v41 }
  0xfd   : > { %v548_v53 = vrot.slane %v530_v46, 7  ;;  %v533_v54 = vmax.f32 %v525_v47, 0.0  ;;  %v523_v56 = vadd.f32 %v2071_v31, %v508_v48  ;;  %v513_v57 = vmul.f32 %v1574_v50, %v2066_v29 }
  0xfe   : > { %v485_v58 = vpop.f32.mrf.mxu0  ;;  %v2115_v8 = vsel %vm565_vm0, 0.0, %v550_v55  ;;  %v2118_v9 = vsel %vm565_vm0, %v550_v55, 0.0 }
  0xff   : > { %v2097_v59 = vsel %vm565_vm0, 0.0, %v548_v53  ;;  %v2100_v60 = vsel %vm565_vm0, %v548_v53, 0.0  ;;  %v551_v61 = vrot.slane %v533_v54, 7  ;;  %v511_v62 = vmul.f32 %v2066_v29, %v485_v58  ;;  %v1792_v54 = vld [vmem:[%s2495_s2 + $0x8] sm:$0xff]  }
 0x100   : > { %v605_v63 = vrot.slane %v2100_v60, 1  ;;  %v531_v0 = vmax.f32 %v523_v56, 0.0  ;;  %v1575_v3 = vpop.f32.mrf.mxu0  ;;  %v528_v5 = vadd.f32 %v2071_v31, %v513_v57  ;;  %v604_v7 = vrot.slane %v2097_v59, 1  ;;  %1513 = vmatpush3.bf16.msra.mxu1 %v1792_v54 }
 0x101   : > { %v2109_v4 = vsel %vm565_vm0, 0.0, %v551_v61  ;;  %v526_v6 = vadd.f32 %v2071_v31, %v511_v62  ;;  %v514_v23 = vmul.f32 %v1575_v3, %v2066_v29  ;;  %v2134_v27 = vsel %vm565_vm0, %v551_v61, 0.0 }
 0x102   : > { %v549_v10 = vrot.slane %v531_v0, 7  ;;  %v1649_v19 = vpack.i.bf16 %v2109_v4, %v2115_v8  ;;  %v2124_v22 = vsel %vm600_vm1, %v604_v7, %v605_v63  ;;  %v488_v24 = vpop.f32.mrf.mxu0  ;;  %v660_v33 = vrot.slane %v2118_v9, 2  ;;  %v1793_v63 = vld [vmem:[%s2495_s2 + $0x40] sm:$0xff]  }
 0x103   : > { %v534_v16 = vmax.f32 %v526_v6, 0.0  ;;  %v1654_v32 = vpack.i.bf16 %v2124_v22, %v2105_v1  ;;  %v536_v34 = vmax.f32 %v528_v5, 0.0  ;;  %v529_v39 = vadd.f32 %v2071_v31, %v514_v23  ;;  %1514 = vmatprep.subr.bf16.mxu1 %v1793_v63 }
 0x104   : > { %v2137_v28 = vsel %vm565_vm0, 0.0, %v549_v10  ;;  %v2140_v30 = vsel %vm565_vm0, %v549_v10, 0.0  ;;  %1650 = vrot.lane.b32.xlu1 %v1649_v19, %s1862_s25  ;;  %v512_v40 = vmul.f32 %v2066_v29, %v488_v24  ;;  %v654_v43 = vrot.slane %v2100_v60, 2  ;;  %1515 = vmatpush3.bf16.msra.mxu1 %v1794_v25 }
 0x105   : > { %v552_v35 = vrot.slane %v534_v16, 7  ;;  %v656_v37 = vrot.slane %v2137_v28, 2  ;;  %v657_v38 = vrot.slane %v2140_v30, 2  ;;  %1655 = vrot.lane.b32.xlu0 %v1654_v32, %s1863_s28  ;;  %v663_v44 = vrot.slane %v2134_v27, 2  ;;  %1600 = vmatprep.subr.bf16.mxu1 %v2031_v20 }
 0x106   : > { %v537_v29 = vmax.f32 %v529_v39, 0.0  ;;  %v527_v50 = vadd.f32 %v2071_v31, %v512_v40  ;;  %v653_v51 = vrot.slane %v2097_v59, 2  ;;  %v659_v52 = vrot.slane %v2115_v8, 2 }
 0x107   : > { %v2160_v45 = vsel %vm565_vm0, 0.0, %v552_v35  ;;  %v2163_v46 = vsel %vm565_vm0, %v552_v35, 0.0  ;;  %v662_v53 = vrot.slane %v2109_v4, 2  ;;  %v554_v55 = vrot.slane %v536_v34, 7 }
 0x108   : > { %v665_v47 = vrot.slane %v2160_v45, 2  ;;  %v666_v48 = vrot.slane %v2163_v46, 2  ;;  %v555_v56 = vrot.slane %v537_v29, 7  ;;  %v2181_v58 = vsel %vm649_vm2, %v656_v37, %v657_v38 }
 0x109   : > { %v535_v31 = vmax.f32 %v527_v50, 0.0  ;;  %v655_v60 = vsel %vm649_vm2, %v653_v51, %v654_v43  ;;  %v661_v61 = vsel %vm649_vm2, %v659_v52, %v660_v33  ;;  %v2186_v62 = vsel %vm649_vm2, %v662_v53, %v663_v44 }
 0x10a   : > { %v2178_v57 = vsel %vm649_vm2, %v665_v47, %v666_v48  ;;  %v1659_v0 = vpack.i.bf16 %v655_v60, %v2168_v49  ;;  %v1674_v2 = vpack.i.bf16 %v2186_v62, %v661_v61  ;;  %v608_v3 = vrot.slane %v2140_v30, 1 }
 0x10b   : > { %v553_v5 = vrot.slane %v535_v31, 7  ;;  %v874_v6 = vpack.c.bf16 %v2178_v57, %v2186_v62  ;;  %v611_v7 = vrot.slane %v2118_v9, 1  ;;  %v2198_v10 = vsel %vm565_vm0, %v555_v56, 0.0 }
 0x10c   : > { %1660 = vrot.lane.b32.xlu1 %v1659_v0, %s1864_s26  ;;  %1675 = vrot.lane.b32.xlu0 %v1674_v2, %s1863_s28  ;;  %v871_v15 = vpack.c.bf16 %v661_v61, %v2181_v58  ;;  %v607_v16 = vrot.slane %v2137_v28, 1  ;;  %v2205_v19 = vsel %vm565_vm0, 0.0, %v554_v55  ;;  %v582_v23 = vsel %vm565_vm0, %v554_v55, 0.0 }
 0x10d   : > { %v581_v24 = vsel %vm565_vm0, %v553_v5, 0.0  ;;  %v610_v9 = vrot.slane %v2115_v8, 1  ;;  %v2214_v26 = vsel %vm565_vm0, 0.0, %v555_v56  ;;  %v1664_v30 = vpack.i.bf16 %v2115_v8, %v2137_v28 }
 0x10e   : > { %1580 = vmatprep.mubr.msk.bf16.mxu0 %vm818_vm3, %v871_v15  ;;  %v1679_v32 = vpack.i.bf16 %v2181_v58, %v655_v60  ;;  %v736_v33 = vrot.slane %v2198_v10, 2  ;;  %v2222_v34 = vsel %vm565_vm0, 0.0, %v553_v5  ;;  %v2226_v35 = vsel %vm600_vm1, %v607_v16, %v608_v3 }
 0x10f   : > { %1581 = vmatmul.mubr.msk.bf16.vlgmr.msra.gmra.mxu0 %vm818_vm3, %v874_v6  ;;  %v672_v36 = vrot.slane %v582_v23, 2  ;;  %v669_v37 = vrot.slane %v581_v24, 2  ;;  %v671_v38 = vrot.slane %v2205_v19, 2  ;;  %v2232_v39 = vsel %vm600_vm1, %v610_v9, %v611_v7 }
 0x110   : > { %1665 = vrot.lane.b32.xlu1 %v1664_v30, %s1864_s26  ;;  %1680 = vrot.lane.b32.xlu0 %v1679_v32, %s1863_s28  ;;  %v735_v40 = vrot.slane %v2214_v26, 2  ;;  %v1669_v41 = vpack.i.bf16 %v2137_v28, %v2097_v59  ;;  %v1684_v43 = vpack.i.bf16 %v2232_v39, %v2226_v35  ;;  %v668_v44 = vrot.slane %v2222_v34, 2 }
 0x111   : > { %v617_v47 = vrot.slane %v2163_v46, 1  ;;  %v616_v48 = vrot.slane %v2160_v45, 1  ;;  %v2249_v50 = vsel %vm649_vm2, %v671_v38, %v672_v36  ;;  %v614_v46 = vrot.slane %v2134_v27, 1 }
 0x112   : > { %v2244_v29 = vsel %vm649_vm2, %v735_v40, %v736_v33  ;;  %v2254_v52 = vsel %vm649_vm2, %v668_v44, %v669_v37  ;;  %v613_v53 = vrot.slane %v2109_v4, 1  ;;  %v1699_v54 = vpack.i.bf16 %v2160_v45, %v2109_v4 }
 0x113   : > { %v880_v51 = vpack.c.bf16 %v2168_v49, %v2244_v29  ;;  %v2261_v55 = vsel %vm600_vm1, %v616_v48, %v617_v47  ;;  %v877_v56 = vpack.c.bf16 %v2249_v50, %v2254_v52  ;;  %v1694_v27 = vpack.i.bf16 %v661_v61, %v2181_v58 }
 0x114   : > { %1670 = vrot.lane.b32.xlu1 %v1669_v41, %s1862_s25  ;;  %1685 = vrot.lane.b32.xlu0 %v1684_v43, %s1862_s25  ;;  %v2268_v31 = vsel %vm600_vm1, %v613_v53, %v614_v46  ;;  %v1719_v63 = vpack.i.bf16 %v2205_v19, %v2222_v34  ;;  %v1714_v0 = vpack.i.bf16 %v2178_v57, %v2186_v62  ;;  %v623_v61 = vrot.slane %v582_v23, 1 }
 0x115   : > { %v1704_v60 = vpack.i.bf16 %v2261_v55, %v2268_v31  ;;  %v1729_v58 = vpack.i.bf16 %v2244_v29, %v2249_v50  ;;  %v620_v2 = vrot.slane %v581_v24, 1  ;;  %v619_v3 = vrot.slane %v2222_v34, 1  ;;  %v1471_v29 = vld [vmem:[%s2499_s6] ss:$0 sm:$0xff] }
 0x116   : > { %v622_v5 = vrot.slane %v2205_v19, 1  ;;  %v1724_v6 = vpack.i.bf16 %v2222_v34, %v2160_v45  ;;  %v1734_v7 = vpack.i.bf16 %v2254_v52, %v2178_v57  ;;  %v725_v23 = vrot.slane %v2198_v10, 1 }
 0x117   : > { %v2292_v62 = vsel %vm600_vm1, %v619_v3, %v620_v2  ;;  %v724_v24 = vrot.slane %v2214_v26, 1  ;;  %v1754_v57 = vpack.i.bf16 %v2249_v50, %v2254_v52  ;;  %v1744_v9 = vpack.i.bf16 %v2082_v42, %v2214_v26 }
 0x118   : > { %1690 = vrot.lane.b32.xlu1 %v1684_v43, %s1863_s28  ;;  %1700 = vrot.lane.b32.xlu0 %v1699_v54, %s1864_s26  ;;  %v2295_v15 = vsel %vm600_vm1, %v622_v5, %v623_v61  ;;  %v1764_v10 = vpack.i.bf16 %v2214_v26, %v2205_v19 }
 0x119   : > { %v1749_v16 = vpack.i.bf16 %v2295_v15, %v2292_v62  ;;  %v2310_v25 = vsel %vm600_vm1, %v724_v24, %v725_v23 }
 0x11a   : > { %v1759_v30 = vpack.i.bf16 %v2105_v1, %v2310_v25 }
 0x11c   : > { %1695 = vrot.lane.b32.xlu1 %v1694_v27, %s1864_s26  ;;  %1705 = vrot.lane.b32.xlu0 %v1704_v60, %s1862_s25 }
 0x120   : > { %1710 = vrot.lane.b32.xlu1 %v1704_v60, %s1863_s28  ;;  %1720 = vrot.lane.b32.xlu0 %v1719_v63, %s1864_s26 }
 0x124   : > { %1715 = vrot.lane.b32.xlu1 %v1714_v0, %s1864_s26  ;;  %1730 = vrot.lane.b32.xlu0 %v1729_v58, %s1863_s28 }
 0x128   : > { %1725 = vrot.lane.b32.xlu1 %v1724_v6, %s1862_s25  ;;  %1735 = vrot.lane.b32.xlu0 %v1734_v7, %s1863_s28 }
 0x12c   : > { %1750 = vrot.lane.b32.xlu1 %v1749_v16, %s1863_s28  ;;  %1740 = vrot.lane.b32.xlu0 %v1749_v16, %s1862_s25  ;;  %s1865_s28 = smov [#allocation2]  }
 0x12d   : > { %s1803_s30 = sshll.u32 %s1865_s28, 4  ;;  %s1804_s30 = int_to_ptr.vmem [resolvable:$false] %s1803_s30 }
 0x130   : > { %1755 = vrot.lane.b32.xlu1 %v1754_v57, %s1864_s26  ;;  %1745 = vrot.lane.b32.xlu0 %v1744_v9, %s1864_s26 }
 0x134   : > { %1765 = vrot.lane.b32.xlu1 %v1764_v10, %s1862_s25  ;;  %1760 = vrot.lane.b32.xlu0 %v1759_v30, %s1862_s25  ;;  %s350_s25 = sand.u32 1, %s1851_s14  }
 0x135   : > { %s1436_s11 = sshll.u32 %s350_s25, 6 }
 0x136   : > { %s2426_s12 = scalar_lea.vmem [#allocation2], %s1436_s11  ;;  %s1805_s11 = scalar_lea.vmem %s1804_s30, 2048 }
 0x137   : > { %s1370_s18 = sshll.u32 %s2426_s12, 4  ;;  %s2447_s18 = int_to_ptr.vmem [resolvable:$true] %s1370_s18 }
 0x138   : > { %s1799_s29 = scalar_lea.vmem %s2447_s18, 1024  ;;  %p1806_p0 = scmp.lt.s32.totalorder %s2447_s18, %s1804_s30 }
 0x139   : > { %p1800_p11 = scmp.ne.s32.totalorder %s2447_s18, %s1799_s29  ;;  %p1807_p1 = scmp.lt.s32.totalorder %s1805_s11, %s1799_s29 }
 0x13b   : > { %p1801_p12 = pnand %p1800_p11, %p1961_p5  ;;  %p1808_p2 = por %p1807_p1, %p1806_p0 }
 0x13d   : > { %p1802_p13 = pneg %p1801_p12 }
 0x13f   : > { %p1809_p3 = pnand %p1808_p2, %p1802_p13 }
 0x176   : > { %v2320_v32 = vpop.permute.xlu1 %1650 }
 0x177   : > { %v1656_v33 = vpop.permute.xlu0 %1655 }
 0x178   : > { %v1658_v38 = vunpack.i.h.bf16 %v1656_v33  ;;  %v1657_v40 = vunpack.i.l.bf16 %v1656_v33 }
 0x17a   : > { %v820_v53 = vsel %vm818_vm3, %v2097_v59, %v1658_v38  ;;  %v819_v54 = vsel %vm818_vm3, %v2082_v42, %v1657_v40 }
 0x17e   : > { %v1661_v36 = vpop.permute.xlu1 %1660  ;;  %v1676_v37 = vpop.permute.xlu0 %1675 }
 0x17f   : > { %v1663_v48 = vunpack.i.h.bf16 %v1661_v36  ;;  %v1662_v26 = vunpack.i.l.bf16 %v1661_v36  ;;  %v1678_v23 = vunpack.i.h.bf16 %v1676_v37  ;;  %v1677_v24 = vunpack.i.l.bf16 %v1676_v37 }
 0x181   : > { %v829_v5 = vsel %vm827_vm4, %v820_v53, %v1663_v48  ;;  %v848_v37 = vsel %vm818_vm3, %v2268_v31, %v1678_v23 }
 0x182   : > { %v1666_v41 = vpop.permute.xlu1 %1665  ;;  %v1681_v43 = vpop.permute.xlu0 %1680 }
 0x183   : > { %v1683_v44 = vunpack.i.h.bf16 %v1681_v43  ;;  %v1682_v47 = vunpack.i.l.bf16 %v1681_v43  ;;  %v1668_v27 = vunpack.i.h.bf16 %v1666_v41  ;;  %v1667_v60 = vunpack.i.l.bf16 %v1666_v41 }
 0x184   : > { %v1653_v41 = vunpack.i.h.bf16 %v2320_v32  ;;  %v1652_v43 = vunpack.i.l.bf16 %v2320_v32 }
 0x185   : > { %v845_v1 = vsel %vm818_vm3, %v2124_v22, %v1682_v47  ;;  %v846_v46 = vsel %vm818_vm3, %v2226_v35, %v1683_v44  ;;  %v828_v22 = vsel %vm827_vm4, %v819_v54, %v1662_v26  ;;  %v847_v44 = vsel %vm818_vm3, %v2232_v39, %v1677_v24 }
 0x186   : > { %v1671_v63 = vpop.permute.xlu1 %1670  ;;  %v1686_v0 = vpop.permute.xlu0 %1685  ;;  %v853_v35 = vsel %vm827_vm4, %v845_v1, %v1667_v60  ;;  %v854_v6 = vsel %vm827_vm4, %v846_v46, %v1668_v27 }
 0x187   : > { %v1673_v58 = vunpack.i.h.bf16 %v1671_v63  ;;  %v1672_v61 = vunpack.i.l.bf16 %v1671_v63  ;;  %v1688_v2 = vunpack.i.h.bf16 %v1686_v0  ;;  %v1687_v3 = vunpack.i.l.bf16 %v1686_v0 }
 0x189   : > { %v861_v59 = vsel %vm836_vm5, %v853_v35, %v1687_v3  ;;  %v862_v42 = vsel %vm836_vm5, %v854_v6, %v1688_v2  ;;  %v837_v7 = vsel %vm836_vm5, %v828_v22, %v1672_v61  ;;  %v838_v16 = vsel %vm836_vm5, %v829_v5, %v1673_v58 }
 0x18a   : > { %v1691_v57 = vpop.permute.xlu1 %1690  ;;  %v1701_v9 = vpop.permute.xlu0 %1700  ;;  %v870_v10 = vpack.c.bf16 %v862_v42, %v861_v59  ;;  %v869_v30 = vpack.c.bf16 %v838_v16, %v837_v7 }
 0x18b   : > { %v1693_v33 = vunpack.i.h.bf16 %v1691_v57  ;;  %v1692_v36 = vunpack.i.l.bf16 %v1691_v57  ;;  %v1703_v38 = vunpack.i.h.bf16 %v1701_v9  ;;  %v1702_v40 = vunpack.i.l.bf16 %v1701_v9 }
 0x18c   : > { %1069 = vmatprep.mubr.bf16.mxu1 %v870_v10 }
 0x18d   : > { %1070 = vmatmul.mubr.bf16.vlgmr.msra.gmra.mxu1 %v869_v30  ;;  %v822_v54 = vsel %vm818_vm3, %v2115_v8, %v1693_v33  ;;  %v821_v32 = vsel %vm818_vm3, %v2137_v28, %v1692_v36  ;;  %v856_v39 = vsel %vm827_vm4, %v848_v37, %v1703_v38  ;;  %v855_v31 = vsel %vm827_vm4, %v847_v44, %v1702_v40 }
 0x18e   : > { %v1696_v47 = vpop.permute.xlu1 %1695  ;;  %v1706_v48 = vpop.permute.xlu0 %1705  ;;  %1602 = vmatpush3.bf16.msra.mxu1 %v2031_v20 }
 0x18f   : > { %v1698_v26 = vunpack.i.h.bf16 %v1696_v47  ;;  %v1697_v1 = vunpack.i.l.bf16 %v1696_v47  ;;  %v1708_v46 = vunpack.i.h.bf16 %v1706_v48  ;;  %v1707_v53 = vunpack.i.l.bf16 %v1706_v48  ;;  %1601 = vmatprep.subr.bf16.mxu1 %v2038_v21 }
 0x191   : > { %v830_v27 = vsel %vm827_vm4, %v821_v32, %v1697_v1  ;;  %v831_v20 = vsel %vm827_vm4, %v822_v54, %v1698_v26  ;;  %v863_v60 = vsel %vm836_vm5, %v855_v31, %v1707_v53  ;;  %v864_v63 = vsel %vm836_vm5, %v856_v39, %v1708_v46 }
 0x192   : > { %v1711_v0 = vpop.permute.xlu1 %1710  ;;  %v1721_v58 = vpop.permute.xlu0 %1720  ;;  %v873_v61 = vpack.c.bf16 %v864_v63, %v863_v60  ;;  %v839_v8 = vsel %vm836_vm5, %v830_v27, %v1652_v43  ;;  %v840_v2 = vsel %vm836_vm5, %v831_v20, %v1653_v41  ;;  %1603 = vmatpush3.bf16.msra.mxu1 %v2038_v21 }
 0x193   : > { %v872_v28 = vpack.c.bf16 %v840_v2, %v839_v8  ;;  %v1713_v22 = vunpack.i.h.bf16 %v1711_v0  ;;  %v1712_v35 = vunpack.i.l.bf16 %v1711_v0  ;;  %v1723_v33 = vunpack.i.h.bf16 %v1721_v58 }
 0x194   : > { %1077 = vmatprep.mubr.bf16.mxu1 %v873_v61  ;;  %v1722_v36 = vunpack.i.l.bf16 %v1721_v58 }
 0x195   : > { %1078 = vmatmul.mubr.bf16.gmra.mxu1 %v872_v28  ;;  %v824_v10 = vsel %vm818_vm3, %v2160_v45, %v1713_v22  ;;  %v823_v30 = vsel %vm818_vm3, %v2109_v4, %v1712_v35 }
 0x196   : > { %v1716_v3 = vpop.permute.xlu1 %1715  ;;  %v1731_v5 = vpop.permute.xlu0 %1730 }
 0x197   : > { %v1718_v42 = vunpack.i.h.bf16 %v1716_v3  ;;  %v1717_v7 = vunpack.i.l.bf16 %v1716_v3  ;;  %v1733_v48 = vunpack.i.h.bf16 %v1731_v5  ;;  %v1732_v1 = vunpack.i.l.bf16 %v1731_v5 }
 0x199   : > { %v832_v41 = vsel %vm827_vm4, %v823_v30, %v1717_v7  ;;  %v833_v43 = vsel %vm827_vm4, %v824_v10, %v1718_v42  ;;  %v852_v0 = vsel %vm818_vm3, %v2310_v25, %v1733_v48  ;;  %v851_v58 = vsel %vm818_vm3, %v2295_v15, %v1732_v1 }
 0x19a   : > { %v1726_v6 = vpop.permute.xlu1 %1725  ;;  %v1736_v59 = vpop.permute.xlu0 %1735 }
 0x19b   : > { %v1738_v16 = vunpack.i.h.bf16 %v1736_v59  ;;  %v1737_v23 = vunpack.i.l.bf16 %v1736_v59  ;;  %v1728_v24 = vunpack.i.h.bf16 %v1726_v6  ;;  %v1727_v57 = vunpack.i.l.bf16 %v1726_v6 }
 0x19d   : > { %v849_v9 = vsel %vm818_vm3, %v2261_v55, %v1737_v23  ;;  %v850_v21 = vsel %vm818_vm3, %v2292_v62, %v1738_v16  ;;  %v841_v47 = vsel %vm836_vm5, %v832_v41, %v1727_v57  ;;  %v842_v45 = vsel %vm836_vm5, %v833_v43, %v1728_v24  ;;  %v1795_v24 = vld [vmem:[%s2496_s3 + $0x8] sm:$0xff]   ;;  %v1796_v57 = vld [vmem:[%s2496_s3] sm:$0xff]  }
 0x19e   : > { %v1751_v38 = vpop.permute.xlu1 %1750  ;;  %v1741_v40 = vpop.permute.xlu0 %1740  ;;  %v857_v55 = vsel %vm827_vm4, %v849_v9, %v1722_v36  ;;  %v858_v62 = vsel %vm827_vm4, %v850_v21, %v1723_v33  ;;  %v875_v31 = vpack.c.bf16 %v842_v45, %v841_v47  ;;  %1588 = vmatprep.subr.bf16.mxu0 %v1795_v24 }
 0x19f   : > { %v1743_v44 = vunpack.i.h.bf16 %v1741_v40  ;;  %v1742_v37 = vunpack.i.l.bf16 %v1741_v40  ;;  %v1753_v46 = vunpack.i.h.bf16 %v1751_v38  ;;  %v1752_v53 = vunpack.i.l.bf16 %v1751_v38  ;;  %1589 = vmatpush3.bf16.msra.mxu0 %v1795_v24  ;;  %v1472_v40 = vld [vmem:[%s2500_s7] ss:$0 sm:$0xff] }
 0x1a0   : > { %1590 = vmatprep.subr.bf16.mxu0 %v1796_v57 }
 0x1a1   : > { %v865_v4 = vsel %vm836_vm5, %v857_v55, %v1742_v37  ;;  %v866_v26 = vsel %vm836_vm5, %v858_v62, %v1743_v44  ;;  %v826_v61 = vsel %vm818_vm3, %v2205_v19, %v1753_v46  ;;  %v825_v8 = vsel %vm818_vm3, %v2222_v34, %v1752_v53 }
 0x1a2   : > { %v1756_v54 = vpop.permute.xlu1 %1755  ;;  %v1746_v32 = vpop.permute.xlu0 %1745  ;;  %v876_v39 = vpack.c.bf16 %v866_v26, %v865_v4 }
 0x1a3   : > { %v1758_v27 = vunpack.i.h.bf16 %v1756_v54  ;;  %v1757_v20 = vunpack.i.l.bf16 %v1756_v54  ;;  %v1748_v60 = vunpack.i.h.bf16 %v1746_v32  ;;  %v1747_v63 = vunpack.i.l.bf16 %v1746_v32  ;;  %1591 = vmatpush3.bf16.msra.mxu0 %v1796_v57 }
 0x1a4   : > { %1085 = vmatprep.mubr.bf16.mxu1 %v876_v39 }
 0x1a5   : > { %1086 = vmatmul.mubr.bf16.gmra.mxu1 %v875_v31  ;;  %v834_v6 = vsel %vm827_vm4, %v825_v8, %v1757_v20  ;;  %v835_v59 = vsel %vm827_vm4, %v826_v61, %v1758_v27  ;;  %v860_v25 = vsel %vm827_vm4, %v852_v0, %v1748_v60  ;;  %v859_v15 = vsel %vm827_vm4, %v851_v58, %v1747_v63 }
 0x1a6   : > { %v1766_v2 = vpop.permute.xlu1 %1765  ;;  %v1761_v28 = vpop.permute.xlu0 %1760 }
 0x1a7   : > { %v1768_v3 = vunpack.i.h.bf16 %v1766_v2  ;;  %v1767_v5 = vunpack.i.l.bf16 %v1766_v2  ;;  %v1763_v22 = vunpack.i.h.bf16 %v1761_v28  ;;  %v1762_v35 = vunpack.i.l.bf16 %v1761_v28 }
 0x1a9   : > { %v867_v42 = vsel %vm836_vm5, %v859_v15, %v1762_v35  ;;  %v868_v19 = vsel %vm836_vm5, %v860_v25, %v1763_v22  ;;  %v843_v34 = vsel %vm836_vm5, %v834_v6, %v1767_v5  ;;  %v844_v7 = vsel %vm836_vm5, %v835_v59, %v1768_v3 }
 0x1aa   : > { %v879_v16 = vpack.c.bf16 %v868_v19, %v867_v42  ;;  %v878_v23 = vpack.c.bf16 %v844_v7, %v843_v34 }
 0x1ac   : > { %1093 = vmatprep.mubr.bf16.mxu1 %v879_v16 }
 0x1ad   : > { %1094 = vmatmul.mubr.bf16.gmra.mxu1 %v878_v23 }
 0x1ae   : > { %1584 = vmatprep.mubr.msk.bf16.mxu1 %vm818_vm3, %v877_v56 }
 0x1b5   : > { %1585 = vmatmul.mubr.msk.bf16.vlgmr.msra.gmra.mxu1 %vm818_vm3, %v880_v51 }
 0x1cf   : > { %v1582_v50 = vpop.f32.mrf.mxu0 }
 0x1d1   : > { %v1136_v52 = vpop.f32.mrf.mxu0 }
 0x1d3   : > { %v1583_v49 = vpop.f32.mrf.mxu0 }
 0x1d5   : > { %v1139_v38 = vpop.f32.mrf.mxu0 }
 0x24d   : > { %v1516_v56 = vpop.f32.mrf.mxu1 }
 0x24f   : > { %v1517_v9 = vpop.f32.mrf.mxu1 }
 0x250   : > { %v1518_v21 = vadd.f32 %v1517_v9, %v1516_v56 }
 0x251   : > { %v1519_v51 = vpop.f32.mrf.mxu1 }
 0x252   : > { %v1137_v10 = vadd.f32 %v1518_v21, %v1136_v52 }
 0x253   : > { %v1520_v30 = vpop.f32.mrf.mxu1 }
 0x254   : > { %v1174_v33 = vmul.f32 %v1471_v29, %v1137_v10  ;;  %v1521_v36 = vadd.f32 %v1520_v30, %v1519_v51 }
 0x255   : > { %v1522_v43 = vpop.f32.mrf.mxu1 }
 0x256   : > { %v1140_v41 = vadd.f32 %v1521_v36, %v1139_v38  ;;  %v1189_v44 = vadd.f32 %v1472_v40, %v1174_v33 }
 0x257   : > { %v1523_v55 = vpop.f32.mrf.mxu1 }
 0x258   : > { %v1175_v37 = vmul.f32 %v1471_v29, %v1140_v41  ;;  %v1524_v62 = vadd.f32 %v1523_v55, %v1522_v43  ;;  %v1197_v4 = vmax.f32 %v1189_v44, 0.0  ;;  %v1479_v41 = vld [vmem:[%s2501_s8] ss:$0 sm:$0xff] }
 0x259   : > { %v1525_v45 = vpop.f32.mrf.mxu1 }
 0x25a   : > { %v1190_v47 = vadd.f32 %v1472_v40, %v1175_v37  ;;  %v1145_v48 = vadd.f32 %v1582_v50, %v1524_v62 }
 0x25b   : > { %v1526_v1 = vpop.f32.mrf.mxu1 }
 0x25c   : > { %v1198_v26 = vmax.f32 %v1190_v47, 0.0  ;;  %v1176_v46 = vmul.f32 %v1471_v29, %v1145_v48  ;;  %v1527_v53 = vadd.f32 %v1526_v1, %v1525_v45  ;;  %v1797_v1 = vld [vmem:[%s1985_s21] sm:$0xff] }
 0x25e   : > { %v1205_v54 = vpack.c.bf16 %v1198_v26, %v1197_v4  ;;  %v1148_v32 = vadd.f32 %v1583_v49, %v1527_v53  ;;  %v1191_v39 = vadd.f32 %v1472_v40, %v1176_v46 }
 0x260   : > { %1592 = vmatprep.mubr.msk.bf16.mxu0 %vm818_vm3, %v1205_v54  ;;  %v1177_v31 = vmul.f32 %v1471_v29, %v1148_v32  ;;  %v1199_v20 = vmax.f32 %v1191_v39, 0.0 }
 0x262   : > { %v1192_v27 = vadd.f32 %v1472_v40, %v1177_v31 }
 0x264   : > { %v1200_v60 = vmax.f32 %v1192_v27, 0.0  ;;  %v1798_v27 = vld [vmem:[%s1985_s21 + $0x8] sm:$0xff]  ;;  %s1487_s21 = sshll.u32 %s1944_s17, 10  ;;  %s2453_s17 = scalar_lea.sflag [#allocation3], %s350_s25 }
 0x265   : > { %v1528_v63 = vpop.f32.mrf.mxu1  ;;  %s2445_s27 = scalar_lea.hbm %s2503_s10, %s1487_s21 }
 0x266   : > { %v1206_v0 = vpack.c.bf16 %v1200_v60, %v1199_v20 }
 0x267   : > { %v1529_v58 = vpop.f32.mrf.mxu1 }
 0x268   : > { %1593 = vmatmul.mubr.msk.bf16.vlgmr.msra.gmra.mxu0 %vm818_vm3, %v1206_v0  ;;  %v1530_v6 = vadd.f32 %v1529_v58, %v1528_v63 }
 0x269   : > { %v1531_v61 = vpop.f32.mrf.mxu1 }
 0x26b   : > { %v1532_v8 = vpop.f32.mrf.mxu1 }
 0x26c   : > { %v1533_v34 = vadd.f32 %v1532_v8, %v1531_v61 }
 0x26d   : > { %v1534_v2 = vpop.f32.mrf.mxu1 }
 0x26f   : > { %v1535_v28 = vpop.f32.mrf.mxu1 }
 0x270   : > { %v1536_v22 = vadd.f32 %v1535_v28, %v1534_v2 }
 0x271   : > { %v1537_v3 = vpop.f32.mrf.mxu1 }
 0x273   : > { %v1538_v5 = vpop.f32.mrf.mxu1 }
 0x274   : > { %v1539_v15 = vadd.f32 %v1538_v5, %v1537_v3 }
 0x275   : > { %v1586_v35 = vpop.f32.mrf.mxu1 }
 0x276   : > { %v1161_v59 = vadd.f32 %v1586_v35, %v1536_v22 }
 0x277   : > { %v1152_v25 = vpop.f32.mrf.mxu1 }
 0x278   : > { %v1153_v42 = vadd.f32 %v1530_v6, %v1152_v25  ;;  %v1180_v23 = vmul.f32 %v1471_v29, %v1161_v59 }
 0x279   : > { %v1587_v19 = vpop.f32.mrf.mxu1 }
 0x27a   : > { %v1178_v7 = vmul.f32 %v1471_v29, %v1153_v42  ;;  %v1164_v16 = vadd.f32 %v1587_v19, %v1539_v15  ;;  %v1195_v21 = vadd.f32 %v1472_v40, %v1180_v23 }
 0x27b   : > { %v1155_v24 = vpop.f32.mrf.mxu1 }
 0x27c   : > { %v1181_v57 = vmul.f32 %v1471_v29, %v1164_v16  ;;  %v1156_v50 = vadd.f32 %v1533_v34, %v1155_v24  ;;  %v1193_v52 = vadd.f32 %v1472_v40, %v1178_v7  ;;  %v1203_v33 = vmax.f32 %v1195_v21, 0.0 }
 0x27e   : > { %v1196_v56 = vadd.f32 %v1472_v40, %v1181_v57  ;;  %v1179_v9 = vmul.f32 %v1471_v29, %v1156_v50  ;;  %v1201_v10 = vmax.f32 %v1193_v52, 0.0 }
 0x280   : > { %v1194_v49 = vadd.f32 %v1472_v40, %v1179_v9  ;;  %v1204_v51 = vmax.f32 %v1196_v56, 0.0  ;;  %v1480_v40 = vld [vmem:[%s2502_s9] ss:$0 sm:$0xff] }
 0x282   : > { %v1202_v30 = vmax.f32 %v1194_v49, 0.0  ;;  %v1208_v38 = vpack.c.bf16 %v1204_v51, %v1203_v33 }
 0x284   : > { %v1207_v36 = vpack.c.bf16 %v1202_v30, %v1201_v10 }
 0x286   : > { %1596 = vmatprep.mubr.msk.bf16.mxu0 %vm818_vm3, %v1207_v36 }
 0x287   : > { %1597 = vmatmul.mubr.msk.bf16.gmra.mxu0 %vm818_vm3, %v1208_v38 }
 0x328   : > { %v1594_v29 = vpop.f32.mrf.mxu0 }
 0x329   : > { %v1311_v43 = vmul.f32 %v1594_v29, %v1479_v41 }
 0x32a   : > { %v1271_v44 = vpop.f32.mrf.mxu0 }
 0x32b   : > { %v1326_v37 = vadd.f32 %v1480_v40, %v1311_v43  ;;  %v1309_v55 = vmul.f32 %v1479_v41, %v1271_v44 }
 0x32c   : > { %v1595_v62 = vpop.f32.mrf.mxu0 }
 0x32d   : > { %v1334_v47 = vadd.f32 %v1326_v37, %v2005_v11  ;;  %v1324_v45 = vadd.f32 %v1480_v40, %v1309_v55  ;;  %v1312_v48 = vmul.f32 %v1595_v62, %v1479_v41 }
 0x32e   : > { %v1274_v4 = vpop.f32.mrf.mxu0 }
 0x32f   : > { %v1342_v26 = vmax.f32 %v1334_v47, 0.0  ;;  %v1332_v46 = vadd.f32 %v1797_v1, %v1324_v45  ;;  %v1327_v53 = vadd.f32 %v1480_v40, %v1312_v48  ;;  %v1310_v54 = vmul.f32 %v1479_v41, %v1274_v4 }
 0x331   : > { %1350 = vst [vmem:[%s2426_s12 + $0x10] sm:$0xff] %v1342_v26  ;;  %v1340_v32 = vmax.f32 %v1332_v46, 0.0  ;;  %v1335_v39 = vadd.f32 %v1327_v53, %v2008_v12  ;;  %v1325_v11 = vadd.f32 %v1480_v40, %v1310_v54 }
 0x333   : > { %1348 = vst [vmem:[%s2426_s12] sm:$0xff] %v1340_v32  ;;  %v1343_v31 = vmax.f32 %v1335_v39, 0.0  ;;  %v1333_v20 = vadd.f32 %v1798_v27, %v1325_v11 }
 0x335   : > { %1351 = vst [vmem:[%s2426_s12 + $0x18] sm:$0xff] %v1343_v31  ;;  %v1341_v60 = vmax.f32 %v1333_v20, 0.0 }
 0x337   : > { %1349 = vst [vmem:[%s2426_s12 + $0x8] sm:$0xff] %v1341_v60 }
 0x347   : > { %v1598_v63 = vpop.f32.mrf.mxu0 }
 0x348   : > { %v1315_v0 = vmul.f32 %v1598_v63, %v1479_v41 }
 0x349   : > { %v1287_v58 = vpop.f32.mrf.mxu0 }
 0x34a   : > { %v1330_v61 = vadd.f32 %v1480_v40, %v1315_v0  ;;  %v1313_v8 = vmul.f32 %v1479_v41, %v1287_v58 }
 0x34b   : > { %v1599_v2 = vpop.f32.mrf.mxu0 }
 0x34c   : > { %v1338_v12 = vadd.f32 %v1330_v61, %v2021_v17  ;;  %v1328_v28 = vadd.f32 %v1480_v40, %v1313_v8  ;;  %v1316_v3 = vmul.f32 %v1599_v2, %v1479_v41 }
 0x34d   : > { %v1290_v5 = vpop.f32.mrf.mxu0 }
 0x34e   : > { %v1346_v22 = vmax.f32 %v1338_v12, 0.0  ;;  %v1336_v35 = vadd.f32 %v1328_v28, %v2011_v13  ;;  %v1331_v6 = vadd.f32 %v1480_v40, %v1316_v3  ;;  %v1314_v59 = vmul.f32 %v1479_v41, %v1290_v5 }
 0x350   : > { %1354 = vst [vmem:[%s2426_s12 + $0x30] sm:$0xff] %v1346_v22  ;;  %v1344_v25 = vmax.f32 %v1336_v35, 0.0  ;;  %v1339_v15 = vadd.f32 %v1331_v6, %v2024_v18  ;;  %v1329_v42 = vadd.f32 %v1480_v40, %v1314_v59 }
 0x352   : > { %1352 = vst [vmem:[%s2426_s12 + $0x20] sm:$0xff] %v1344_v25  ;;  %v1347_v17 = vmax.f32 %v1339_v15, 0.0  ;;  %v1337_v19 = vadd.f32 %v1329_v42, %v2014_v14 }
 0x354   : > { %1355 = vst [vmem:[%s2426_s12 + $0x38] sm:$0xff] %v1347_v17  ;;  %v1345_v13 = vmax.f32 %v1337_v19, 0.0 }
 0x356   : > { %1353 = vst [vmem:[%s2426_s12 + $0x28] sm:$0xff] %v1345_v13 }
 0x357   : > { %1812 = shalt.err (!%p1809_p3)
}
 0x358   : > { %s1813_s25 = scalar_lea.hbm %s2445_s27, 1024  ;;  %s1817_s20 = scalar_lea.hbm %s2503_s10, 2048 }
 0x359   : > { %p1814_p4 = scmp.ne.s32.totalorder %s2445_s27, %s1813_s25  ;;  %p1818_p9 = scmp.lt.s32.totalorder %s2445_s27, %s2503_s10 }
 0x35a   : > { %p1819_p10 = scmp.lt.s32.totalorder %s1817_s20, %s1813_s25 }
 0x35b   : > { %p1815_p7 = pnand %p1814_p4, %p1961_p5 }
 0x35c   : > { %p1820_p11 = por %p1819_p10, %p1818_p9 }
 0x35d   : > { %p1816_p8 = pneg %p1815_p7 }
 0x35f   : > { %p1821_p12 = pnand %p1820_p11, %p1816_p8 }
 0x361   : > { %1824 = shalt.err (!%p1821_p12)
}
 0x362   : > { %s1866_s29 = smov 128   ;;  %s1867_s30 = smov 8  }
 0x363   : > { %1604 = dma.vmem_to_hbm [thread:$0]  (%p1961_p5), %s2447_s18, 1024, %s2445_s27, %s2453_s17, %s1866_s29, %s1866_s29, %s1867_s30  }
 0x364 PF: > { %p1610_p13 = scmp.ge.s32.totalorder %s1859_s16, 2  ;;  %s1385_s11 = sand.u32 1, %s1847_s13  }
 0x365   : > { %s1386_s25 = scalar_lea.sflag [#allocation3], %s1385_s11 }
 0x366   : > { %p1607_p0 = pnand %p1610_p13, %p1965_p6 }
 0x368   : > { %p1608_p1 = pneg %p1607_p0 }
 0x36a   : > { %1842 = dma.done.wait (%p1608_p1), %s1386_s25, 1024  }
 0x36b   : > { %1844 = vsyncadd (%p1608_p1), %s1386_s25, 4294966272  ;;  %p20_p2 = scmp.ge.s32.totalorder %s1948_s19, 4   ;;  %s2506_s13 = smov %s1851_s14 }
 0x36c   : > { %s2507_s14 = smov %s1855_s15  ;;  %s2508_s15 = smov %s1959_s22 }
 0x36d   : > { %s2509_s16 = smov %s1948_s19  ;;  %22 = sbr.rel (!%p20_p2) target bundleno = 3 (0x3), region = 95 }
 0x372   :  { %1391 = vsyncpa [#allocation3], 1 }
 0x373   :  { %1393 = vsyncpa [#allocation3 + $0x1], 1 }

</bundles_post_ra>
